<compile_context>
chip_gen: v5e
topology: v5e:2x2
jax: 0.10.0
libtpu: 0.0.40
codegen_flags: <defaults>
</compile_context>

<pallas_src>
import jax
import jax.numpy as jnp
from jax.experimental import pallas as pl
from jax.experimental.pallas import tpu as pltpu


def _add_pos_kernel(x_ref, pe_ref, o_ref):
    # (b_blk, l_blk) + (1, l_blk) broadcast add on the VPU. pe was pre-cast to the
    # output dtype in the wrapper, so the only in-kernel cast is x -> out dtype
    # (a no-op when dtypes already match).
    o_ref[...] = x_ref[...].astype(o_ref.dtype) + pe_ref[...]


def _vmem_capacity_bytes():
    """Physical per-TensorCore VMEM, queried at trace time; conservative fallback."""
    try:
        info = pltpu.get_tpu_info()
        cap = getattr(info, "vmem_capacity_bytes", None)
        if cap:
            return int(cap)
    except Exception:
        pass
    return 64 * 1024 * 1024  # v7x worst case


def _pick_tiles(B, L, bytes_per_elem, step_bytes):
    """Choose (b_blk, l_blk).

    bytes_per_elem: combined x+out bytes per element of a tile.
    step_bytes:     byte budget for one (x-tile + out-tile) buffer pair.
    Tiles obey the (8, 128) rule: each block dim is a multiple of 8/128 or equals the
    full array dim; partial last tiles are handled by Pallas' OOB masking.
    """
    if L % 128 == 0:
        # Largest multiple-of-128 lane width such that 8 sublane rows fit the budget.
        max_lanes = max(128, (step_bytes // (8 * bytes_per_elem)) // 128 * 128)
        l_blk = min(L, max_lanes)
    else:
        # Non-128-aligned L: the block dim must equal the full array dim.
        l_blk = L

    rows_fit = max(1, step_bytes // (l_blk * bytes_per_elem))
    if rows_fit >= B:
        b_blk = B                               # full batch dim (always legal)
    else:
        b_blk = min(B, max(8, (rows_fit // 8) * 8))  # multiple of 8; last tile masked
    return b_blk, l_blk


def positional_encoding_forward(x, position_embeddings, *, tile_bytes=None):
    """x: (B, S, D), position_embeddings: (1, S, D) -> (B, S, D) in promoted dtype."""
    B, S, D = x.shape
    assert position_embeddings.shape == (1, S, D), position_embeddings.shape

    # PyTorch-parity dtype promotion (bf16 x + f32 param -> f32 output).
    out_dtype = jnp.promote_types(x.dtype, position_embeddings.dtype)

    L = S * D
    x2 = x.reshape(B, L)                                        # lane-dense view
    pe2 = position_embeddings.reshape(1, L).astype(out_dtype)   # single wrapper cast

    x_item = jnp.dtype(x.dtype).itemsize
    out_item = jnp.dtype(out_dtype).itemsize
    pe_item = jnp.dtype(out_dtype).itemsize
    bytes_per_elem = x_item + out_item

    # Generation-tuned VMEM budget: scoped limit = half of physical VMEM
    # (64 MiB on v5e/v6e, 32 MiB on v7x); per-step budget = half of that
    # (double buffering) minus margin for pe + internal scratch, capped at 16 MiB.
    vmem_cap = _vmem_capacity_bytes()
    vmem_limit = vmem_cap // 2
    if tile_bytes is None:
        tile_bytes = min(16 * 1024 * 1024, max(2 * 1024 * 1024, vmem_limit // 2 - (4 << 20)))

    b_blk, l_blk = _pick_tiles(B, L, bytes_per_elem, tile_bytes)
    num_l = pl.cdiv(L, l_blk)
    num_b = pl.cdiv(B, b_blk)

    # v7x megacore: if the whole problem collapsed to a single grid step but is large
    # enough to care, split L so the sharded parallel axis has >= 2 steps
    # (no-op on single-TC v5e/v6e beyond one extra cheap grid step).
    if num_l == 1 and num_b == 1 and L % 128 == 0 and L >= 256 \
            and B * L * bytes_per_elem > (2 << 20):
        l_blk = max(128, ((L // 2) + 127) // 128 * 128)
        num_l = pl.cdiv(L, l_blk)

    # Double-buffered VMEM footprint; widen the scoped limit (within physical VMEM)
    # for awkward shapes rather than failing to compile.
    footprint = 2 * b_blk * l_blk * bytes_per_elem + 2 * l_blk * pe_item
    if footprint + (2 << 20) > vmem_limit:
        vmem_limit = min(int(vmem_cap * 0.9), footprint + (4 << 20))
    assert footprint <= vmem_limit, (
        f"tile ({b_blk}, {l_blk}) needs {footprint} B of VMEM > limit {vmem_limit} B")
    # TODO(synk): for non-128-aligned L so large that even a single 8-row tile
    # overflows VMEM, fall back to tiling the (B*S, D) layout with masked stores.

    cost = pl.CostEstimate(
        flops=B * L,
        transcendentals=0,
        # x read + out write once; pe read once total (resident across the batch loop).
        bytes_accessed=B * L * (x_item + out_item) + L * pe_item,
    )

    if num_l >= 2:
        # L tiles on the slow (first) axis, batch tiles inner: the pe block index
        # depends only on the slow axis, so pe is DMA'd once per L tile and stays
        # resident in VMEM across the whole batch loop.
        grid = (num_l, num_b)
        x_map = lambda l, b: (b, l)
        pe_map = lambda l, b: (0, l)
        dims = ("parallel", "parallel")
    else:
        # Single L tile: collapse to a 1-D batch grid so the multi-step axis is the
        # one Mosaic can shard across the two v7x TensorCores. pe index is constant,
        # so it is fetched once and reused.
        grid = (num_b,)
        x_map = lambda b: (b, 0)
        pe_map = lambda b: (0, 0)
        dims = ("parallel",)

    out2 = pl.pallas_call(
        _add_pos_kernel,
        out_shape=jax.ShapeDtypeStruct((B, L), out_dtype),
        grid_spec=pltpu.PrefetchScalarGridSpec(
            num_scalar_prefetch=0,
            grid=grid,
            in_specs=[
                pl.BlockSpec((b_blk, l_blk), x_map),   # x tile
                pl.BlockSpec((1, l_blk), pe_map),      # pos-emb tile (broadcast row)
            ],
            out_specs=pl.BlockSpec((b_blk, l_blk), x_map),
        ),
        compiler_params=pltpu.CompilerParams(
            dimension_semantics=dims,
            vmem_limit_bytes=int(vmem_limit),
        ),
        cost_estimate=cost,
    )(x2, pe2)

    return out2.reshape(B, S, D)


class PositionalEncoding:
    """Mirror of the PyTorch module: holds a (1, seq_length, embedding_dim) parameter."""

    def __init__(self, max_position_embeddings, embedding_dim, seq_length,
                 key=None, param_dtype=jnp.float32):
        # PyTorch init is torch.zeros; use a small deterministic random init instead so
        # the addition is observable in the correctness check (documented departure).
        if key is None:
            key = jax.random.PRNGKey(42)
        self.position_embeddings = (
            0.02 * jax.random.normal(key, (1, seq_length, embedding_dim), dtype=jnp.float32)
        ).astype(param_dtype)

    def __call__(self, x, position_ids=None):
        # position_ids is unused in the reference forward.
        return positional_encoding_forward(x, self.position_embeddings)


if __name__ == "__main__":
    # Check 1: small demo shapes consistent with the module: batch=2, seq=8, hidden=32.
    B, S, D = 2, 8, 32
    key = jax.random.PRNGKey(0)
    kx, kp, kx2, kp2, kx3, kp3 = jax.random.split(key, 6)

    x = jax.random.normal(kx, (B, S, D), dtype=jnp.float32)
    module = PositionalEncoding(max_position_embeddings=512, embedding_dim=D,
                                seq_length=S, key=kp)
    out = jax.block_until_ready(module(x))
    ref = x + module.position_embeddings
    assert out.shape == (B, S, D)
    assert out.dtype == jnp.float32
    assert jnp.allclose(out, ref, atol=1e-6, rtol=1e-6)

    # Check 2: mixed-dtype path with PyTorch promotion semantics
    # (bf16 activations + f32 parameter -> f32 output), multiple batch grid steps.
    B2, S2, D2 = 32, 512, 256
    x_big = jax.random.normal(kx2, (B2, S2, D2), dtype=jnp.bfloat16)
    module_big = PositionalEncoding(max_position_embeddings=1024, embedding_dim=D2,
                                    seq_length=S2, key=kp2, param_dtype=jnp.float32)
    out_big = jax.block_until_ready(module_big(x_big))
    ref_big = x_big.astype(jnp.float32) + module_big.position_embeddings
    assert out_big.shape == (B2, S2, D2)
    assert out_big.dtype == jnp.float32
    assert jnp.allclose(out_big, ref_big, atol=1e-2, rtol=1e-2)

    # Check 3: force small tiles to exercise the 2-D (L, B) grid, the resident-pe
    # inner batch loop, and masked partial tiles on both the last L and batch tiles.
    B3, S3, D3 = 10, 97, 128           # L = 12416 = 128 * 97 (not divisible by 4096)
    x3 = jax.random.normal(kx3, (B3, S3, D3), dtype=jnp.float32)
    pe3 = 0.02 * jax.random.normal(kp3, (1, S3, D3), dtype=jnp.float32)
    out3 = jax.block_until_ready(
        positional_encoding_forward(x3, pe3, tile_bytes=256 * 1024))
    ref3 = x3 + pe3
    assert out3.shape == (B3, S3, D3)
    assert jnp.allclose(out3, ref3, atol=1e-6, rtol=1e-6)

    print("KERNEL_OK")
</pallas_src>

<mosaic_0001>
module attributes {stable_mosaic.version = 11 : i64} {
  func.func @_add_pos_kernel(%arg0: i32, %arg1: memref<2x256xf32, #tpu.memory_space<vmem>>, %arg2: memref<1x256xf32, #tpu.memory_space<vmem>>, %arg3: memref<2x256xf32, #tpu.memory_space<vmem>>) attributes {dimension_semantics = [#tpu.dimension_semantics<parallel>], iteration_bounds = array<i64: 1>, scalar_prefetch = 0 : i64, scratch_operands = 0 : i64, tpu.core_type = #tpu.core_type<tc>, window_params = [{transform_indices = @transform_0, window_bounds = array<i64: 2, 256>}, {pipeline_mode = #tpu.pipeline_mode<synchronous>, transform_indices = @transform_1, window_bounds = array<i64: 1, 256>}, {transform_indices = @transform_2, window_bounds = array<i64: 2, 256>}]} {
    %c0 = arith.constant 0 : index
    %c0_0 = arith.constant 0 : index
    %0 = vector.load %arg1[%c0, %c0_0] : memref<2x256xf32, #tpu.memory_space<vmem>>, vector<2x256xf32>
    %c0_1 = arith.constant 0 : index
    %c0_2 = arith.constant 0 : index
    %1 = vector.load %arg2[%c0_1, %c0_2] : memref<1x256xf32, #tpu.memory_space<vmem>>, vector<1x256xf32>
    %2 = vector.broadcast %1 : vector<1x256xf32> to vector<2x256xf32>
    %3 = arith.addf %0, %2 : vector<2x256xf32>
    %c0_3 = arith.constant 0 : index
    %c0_4 = arith.constant 0 : index
    %4 = vector.load %arg3[%c0_3, %c0_4] : memref<2x256xf32, #tpu.memory_space<vmem>>, vector<2x256xf32>
    tpu.vector_store %arg3[%c0_3, %c0_4], %3 {strides = array<i32>} : memref<2x256xf32, #tpu.memory_space<vmem>>, vector<2x256xf32>,
    return
  }
  func.func @transform_0(%arg0: i32) -> (i32, i32) {
    %c0_i32 = arith.constant 0 : i32
    %c0_i32_0 = arith.constant 0 : i32
    return %arg0, %c0_i32 : i32, i32
  }
  func.func @transform_1(%arg0: i32) -> (i32, i32) {
    %c0_i32 = arith.constant 0 : i32
    %c0_i32_0 = arith.constant 0 : i32
    %c0_i32_1 = arith.constant 0 : i32
    return %c0_i32, %c0_i32_0 : i32, i32
  }
  func.func @transform_2(%arg0: i32) -> (i32, i32) {
    %c0_i32 = arith.constant 0 : i32
    %c0_i32_0 = arith.constant 0 : i32
    return %arg0, %c0_i32 : i32, i32
  }
}

</mosaic_0001>

<bundles_post_ra>
// kernel: tpu_custom_call.1
= control target key start
LH: loop header
LB: loop body
LE: loop exit
PB: predicated region body
PF: predicated region fallthrough
CT: control target
= control target key end

     0   :  { %7 = vsyncpa [#allocation3], 0  ;;  %s177_s0 = inlined_call_operand.hbm [shape: f32[2,256], index: 0, kind: input, shape index: {}]   ;;  %s178_s1 = inlined_call_operand.hbm [shape: f32[1,256], index: 1, kind: input, shape index: {}]   ;;  %s179_s2 = inlined_call_operand.hbm [shape: f32[2,256], index: 2, kind: output, shape index: {}]  }
   0x1   :  { %8 = vsyncpa [#allocation6], 0 }
   0x2   :  { %9 = vsyncpa [#allocation4], 0  ;;  %s15_s11 = sshll.u32 %s177_s0, 4  ;;  %s150_s12 = smov [#allocation2]   ;;  %s16_s11 = int_to_ptr.hbm [resolvable:$true] %s15_s11 }
   0x3   :  { %s17_s13 = sshll.u32 %s150_s12, 4  ;;  %s26_s16 = sshll.u32 %s178_s1, 4  ;;  %s18_s13 = int_to_ptr.vmem [resolvable:$true] %s17_s13  ;;  %s27_s16 = int_to_ptr.hbm [resolvable:$true] %s26_s16 }
   0x4   :  { %20 = dma.hbm_to_vmem [thread:$0]  %s16_s11, 64, %s18_s13, [#allocation3]  }
   0x5   :  { %s151_s17 = smov [#allocation5]  }
   0x6   :  { %s28_s18 = sshll.u32 %s151_s17, 4  ;;  %s29_s18 = int_to_ptr.vmem [resolvable:$true] %s28_s18 }
   0x7   :  { %31 = dma.hbm_to_vmem [thread:$0]  %s27_s16, 32, %s29_s18, [#allocation6]  }
   0x8   :  { %144 = dma.done.wait [#allocation3], 64  }
   0x9   :  { %145 = vsyncadd [#allocation3], 4294967232 }
   0xa   :  { %146 = dma.done.wait [#allocation6], 32  }
   0xb   :  { %147 = vsyncadd [#allocation6], 4294967264  ;;  %v41_v0 = vld [vmem:[#allocation5] sm:$0x3]  ;;  %vm46_vm0 = vcmask 1041408   ;;  %s152_s0 = smov [#allocation7]  }
   0xc   :  { %v43_v1 = vperm.slane %v41_v0, 0  ;;  %v44_v2 = vperm.slane %v41_v0, 1  ;;  %v40_v3 = vld [vmem:[#allocation2] sm:$0xf]  ;;  %s56_s19 = sshll.u32 %s152_s0, 4  ;;  %s58_s21 = sshll.u32 %s179_s2, 4  ;;  %s57_s19 = int_to_ptr.vmem [resolvable:$true] %s56_s19  ;;  %s59_s21 = int_to_ptr.hbm [resolvable:$true] %s58_s21 }
   0xe   :  { %v45_v4 = vrot.slane %v44_v2, 6 }
  0x10   :  { %v47_v5 = vsel %vm46_vm0, %v43_v1, %v45_v4 }
  0x11   :  { %v49_v6 = vadd.f32 %v47_v5, %v40_v3 }
  0x13   :  { %50 = vst [vmem:[#allocation7] sm:$0xf] %v49_v6 }
  0x14   :  { %61 = dma.vmem_to_hbm [thread:$0]  %s57_s19, 64, %s59_s21, [#allocation4]  }
  0x15   :  { %148 = dma.done.wait [#allocation4], 64  }
  0x16   :  { %149 = vsyncadd [#allocation4], 4294967232 }
  0x17   :  { %66 = vsyncpa [#allocation3], 1 }
  0x18   :  { %67 = vsyncpa [#allocation6], 1 }
  0x19   :  { %68 = vsyncpa [#allocation4], 1 }

</bundles_post_ra>
